<compile_context>
chip_gen: v7x
topology: tpu7x:2x2x1
jax: 0.10.0
libtpu: 0.0.40
codegen_flags: <defaults>
</compile_context>

<pallas_src>
import jax
import jax.numpy as jnp
from jax.experimental import pallas as pl
from jax.experimental.pallas import tpu as pltpu

# ---------------- config (small, consistent with the module) ----------------
NUM_EXPERTS = 4
TOPK = 2
EMB_DIM = 32
BATCH = 2
SEQ = 8


# ------------------------------- Pallas kernel -------------------------------
def noisy_router_kernel(x_ref, w_ref, out_ref):
    """x_ref: (N, D+1) f32 (ones column appended)
       w_ref: (D+1, E) f32 (bias folded in as the last row)
       out_ref: (N, E+K) f32 — cols [0,E): scores, cols [E,E+K): indices (as f32)."""
    logits = jnp.dot(x_ref[...], w_ref[...],
                     preferred_element_type=jnp.float32,
                     precision=jax.lax.Precision.HIGHEST)            # (N, E)
    n, e = logits.shape
    k = out_ref.shape[-1] - e                   # static at trace time
    assert 0 < k < e                            # packing/sentinel tricks need k < e

    idx_bits = max((e - 1).bit_length(), 1)
    lowmask = (1 << idx_bits) - 1

    col = jax.lax.broadcasted_iota(jnp.int32, (n, e), 1)
    kcol = jax.lax.broadcasted_iota(jnp.int32, (n, k), 1)

    # Sortable int32 key: monotonic w.r.t. the f32 value under signed compare.
    bits = jax.lax.bitcast_convert_type(logits, jnp.int32)
    skey = jnp.where(bits < 0, bits ^ jnp.int32(0x7FFFFFFF), bits)
    # Pack "lowest index wins ties" into the low bits (perturbs the key by at
    # most `lowmask` ULPs — only used for ordering and the softmax shift).
    packed = (skey & jnp.int32(~lowmask)) | (jnp.int32(e - 1) - col)

    sentinel = jnp.int32(jnp.iinfo(jnp.int32).min)   # < key of any finite logit
    work = packed
    idx_out = jnp.zeros((n, k), jnp.int32)
    m = None
    for j in range(k):                               # small static K -> unrolled
        best = jnp.max(work, axis=-1, keepdims=True)         # 1 XLU reduce/round
        sel_idx = jnp.int32(e - 1) - (best & jnp.int32(lowmask))      # (N, 1)
        if j == 0:
            # Decode (approximate) row max for softmax stability; softmax is
            # shift-invariant so the replaced low mantissa bits don't matter.
            dec = jnp.where(best < 0, best ^ jnp.int32(0x7FFFFFFF), best)
            m = jax.lax.bitcast_convert_type(dec, jnp.float32)
        idx_out = jnp.where(kcol == j, sel_idx, idx_out)
        work = jnp.where(col == sel_idx, sentinel, work)  # mask ONLY chosen slot

    # Chosen slots are exactly the ones we overwrote with the sentinel.
    selected = work != packed
    p = jnp.where(selected, jnp.exp(logits - m), 0.0)
    denom = jnp.sum(p, axis=-1, keepdims=True)
    out_ref[:, :e] = p / denom                      # exact divide: rows sum to 1
    out_ref[:, e:] = idx_out.astype(jnp.float32)    # small ints exact in f32


def noisy_router(x, wr, br, *, topk=TOPK):
    """x: (B, T, D) f32 -> (router_scores (B,T,E) f32, topk_indices (B,T,K) i32)."""
    B, T, D = x.shape
    N = B * T
    E = wr.shape[1]

    # Fold the bias into the matmul: one fewer kernel operand / DMA.
    x_aug = jnp.concatenate(
        [x.reshape(N, D), jnp.ones((N, 1), x.dtype)], axis=-1)        # (N, D+1)
    w_aug = jnp.concatenate([wr, br.reshape(1, E)], axis=0)            # (D+1, E)

    vmem = pl.BlockSpec(memory_space=pltpu.MemorySpace.VMEM)
    out = pl.pallas_call(
        noisy_router_kernel,
        out_shape=jax.ShapeDtypeStruct((N, E + topk), jnp.float32),
        in_specs=[vmem, vmem],       # whole (tiny) arrays staged once into VMEM
        out_specs=vmem,
        # No grid: single invocation; everything fits in a few KiB of VMEM.
    )(x_aug, w_aug)

    scores = out[:, :E].reshape(B, T, E)
    idx = out[:, E:].astype(jnp.int32).reshape(B, T, topk)
    return scores, idx


# ---------------------------- pure-JAX reference -----------------------------
def noisy_router_ref(x, wr, br, *, topk=TOPK):
    B, T, D = x.shape
    x2d = x.reshape(-1, D)
    logits = jnp.dot(x2d, wr, precision=jax.lax.Precision.HIGHEST) + br  # (N, E)
    topv, topi = jax.lax.top_k(logits, topk)
    rows = jnp.arange(logits.shape[0])[:, None]
    sparse = jnp.full_like(logits, -jnp.inf).at[rows, topi].set(topv)
    scores = jax.nn.softmax(sparse, axis=-1)
    return scores.reshape(B, T, -1), topi.reshape(B, T, topk)


# ------------------------------ param init -----------------------------------
def init_params(key):
    """PyTorch-Linear-style uniform(-1/sqrt(fan_in), 1/sqrt(fan_in)) init."""
    ks = jax.random.split(key, 4)
    bnd = 1.0 / jnp.sqrt(EMB_DIM)

    def u(k, shape):
        return jax.random.uniform(k, shape, jnp.float32, -bnd, bnd)

    wr = u(ks[0], (EMB_DIM, NUM_EXPERTS))   # router_linear.weight (transposed)
    br = u(ks[1], (1, NUM_EXPERTS))         # router_linear.bias
    wn = u(ks[2], (EMB_DIM, NUM_EXPERTS))   # noisy_linear.weight  (output-inert)
    bn = u(ks[3], (1, NUM_EXPERTS))         # noisy_linear.bias    (output-inert)
    return wr, br, wn, bn


if __name__ == "__main__":
    key = jax.random.PRNGKey(0)
    kx, kp = jax.random.split(key)
    x = jax.random.normal(kx, (BATCH, SEQ, EMB_DIM), jnp.float32)
    wr, br, wn, bn = init_params(kp)   # wn/bn unused: noisy branch never reaches the outputs

    scores, idx = noisy_router(x, wr, br)
    scores = jax.block_until_ready(scores)
    idx = jax.block_until_ready(idx)

    ref_scores, ref_idx = noisy_router_ref(x, wr, br)
    assert scores.shape == (BATCH, SEQ, NUM_EXPERTS)
    assert idx.shape == (BATCH, SEQ, TOPK)
    assert jnp.allclose(scores, ref_scores, rtol=1e-3, atol=1e-5), "scores mismatch"
    assert jnp.array_equal(idx, ref_idx), "indices mismatch"
    print("KERNEL_OK")
</pallas_src>

<mosaic_0001>
module attributes {stable_mosaic.version = 11 : i64} {
  func.func @noisy_router_kernel(%arg0: memref<16x33xf32, #tpu.memory_space<vmem>>, %arg1: memref<33x4xf32, #tpu.memory_space<vmem>>, %arg2: memref<16x6xf32, #tpu.memory_space<vmem>>) attributes {dimension_semantics = [], scalar_prefetch = 0 : i64, scratch_operands = 0 : i64, tpu.core_type = #tpu.core_type<tc>} {
    %c0 = arith.constant 0 : index
    %c0_0 = arith.constant 0 : index
    %0 = vector.load %arg0[%c0, %c0_0] : memref<16x33xf32, #tpu.memory_space<vmem>>, vector<16x33xf32>
    %c0_1 = arith.constant 0 : index
    %c0_2 = arith.constant 0 : index
    %1 = vector.load %arg1[%c0_1, %c0_2] : memref<33x4xf32, #tpu.memory_space<vmem>>, vector<33x4xf32>
    %cst = arith.constant dense<0.000000e+00> : vector<16x4xf32>
    %2 = tpu.matmul %0, %1, %cst {dimension_numbers = #tpu.dot_dimension_numbers<[1], [0], [0], [1], [0, 0, 1, 1], [], []>, precision = #tpu.contract_precision<fp32>} : vector<16x33xf32>, vector<33x4xf32>, vector<16x4xf32> -> vector<16x4xf32>
    %3 = tpu.iota {dimensions = array<i32: 1>} : vector<16x4xi32>
    %4 = tpu.iota {dimensions = array<i32: 1>} : vector<16x2xi32>
    %5 = tpu.bitcast %2 : vector<16x4xf32> -> vector<16x4xi32>
    %c0_i32 = arith.constant 0 : i32
    %6 = vector.broadcast %c0_i32 : i32 to vector<16x4xi32>
    %7 = arith.cmpi slt, %5, %6 : vector<16x4xi32>
    %c2147483647_i32 = arith.constant 2147483647 : i32
    %8 = vector.broadcast %c2147483647_i32 : i32 to vector<16x4xi32>
    %9 = arith.xori %5, %8 : vector<16x4xi32>
    %10 = arith.select %7, %9, %5 : vector<16x4xi1>, vector<16x4xi32>
    %c-4_i32 = arith.constant -4 : i32
    %11 = vector.broadcast %c-4_i32 : i32 to vector<16x4xi32>
    %12 = arith.andi %10, %11 : vector<16x4xi32>
    %c3_i32 = arith.constant 3 : i32
    %13 = vector.broadcast %c3_i32 : i32 to vector<16x4xi32>
    %14 = arith.subi %13, %3 : vector<16x4xi32>
    %15 = arith.ori %12, %14 : vector<16x4xi32>
    %c0_i32_3 = arith.constant 0 : i32
    %16 = vector.broadcast %c0_i32_3 : i32 to vector<16x2xi32>
    %cst_4 = arith.constant dense<-2147483648> : vector<16xi32>
    %17 = vector.multi_reduction <maxsi>, %15, %cst_4 [1] : vector<16x4xi32> to vector<16xi32>
    %18 = vector.shape_cast %17 : vector<16xi32> to vector<16x1xi32>
    %c3_i32_5 = arith.constant 3 : i32
    %19 = vector.broadcast %c3_i32_5 : i32 to vector<16x1xi32>
    %20 = arith.andi %18, %19 : vector<16x1xi32>
    %c3_i32_6 = arith.constant 3 : i32
    %21 = vector.broadcast %c3_i32_6 : i32 to vector<16x1xi32>
    %22 = arith.subi %21, %20 : vector<16x1xi32>
    %c0_i32_7 = arith.constant 0 : i32
    %23 = vector.broadcast %c0_i32_7 : i32 to vector<16x1xi32>
    %24 = arith.cmpi slt, %18, %23 : vector<16x1xi32>
    %c2147483647_i32_8 = arith.constant 2147483647 : i32
    %25 = vector.broadcast %c2147483647_i32_8 : i32 to vector<16x1xi32>
    %26 = arith.xori %18, %25 : vector<16x1xi32>
    %27 = arith.select %24, %26, %18 : vector<16x1xi1>, vector<16x1xi32>
    %28 = tpu.bitcast %27 : vector<16x1xi32> -> vector<16x1xf32>
    %c0_i32_9 = arith.constant 0 : i32
    %29 = vector.broadcast %c0_i32_9 : i32 to vector<16x2xi32>
    %30 = arith.cmpi eq, %4, %29 : vector<16x2xi32>
    %31 = vector.shape_cast %22 : vector<16x1xi32> to vector<16x1xi32>
    %32 = vector.broadcast %31 : vector<16x1xi32> to vector<16x2xi32>
    %33 = arith.select %30, %32, %16 : vector<16x2xi1>, vector<16x2xi32>
    %34 = vector.broadcast %22 : vector<16x1xi32> to vector<16x4xi32>
    %35 = arith.cmpi eq, %3, %34 : vector<16x4xi32>
    %c-2147483648_i32 = arith.constant -2147483648 : i32
    %36 = vector.broadcast %c-2147483648_i32 : i32 to vector<16x4xi32>
    %37 = arith.select %35, %36, %15 : vector<16x4xi1>, vector<16x4xi32>
    %cst_10 = arith.constant dense<-2147483648> : vector<16xi32>
    %38 = vector.multi_reduction <maxsi>, %37, %cst_10 [1] : vector<16x4xi32> to vector<16xi32>
    %39 = vector.shape_cast %38 : vector<16xi32> to vector<16x1xi32>
    %c3_i32_11 = arith.constant 3 : i32
    %40 = vector.broadcast %c3_i32_11 : i32 to vector<16x1xi32>
    %41 = arith.andi %39, %40 : vector<16x1xi32>
    %c3_i32_12 = arith.constant 3 : i32
    %42 = vector.broadcast %c3_i32_12 : i32 to vector<16x1xi32>
    %43 = arith.subi %42, %41 : vector<16x1xi32>
    %c1_i32 = arith.constant 1 : i32
    %44 = vector.broadcast %c1_i32 : i32 to vector<16x2xi32>
    %45 = arith.cmpi eq, %4, %44 : vector<16x2xi32>
    %46 = vector.shape_cast %43 : vector<16x1xi32> to vector<16x1xi32>
    %47 = vector.broadcast %46 : vector<16x1xi32> to vector<16x2xi32>
    %48 = arith.select %45, %47, %33 : vector<16x2xi1>, vector<16x2xi32>
    %49 = vector.broadcast %43 : vector<16x1xi32> to vector<16x4xi32>
    %50 = arith.cmpi eq, %3, %49 : vector<16x4xi32>
    %c-2147483648_i32_13 = arith.constant -2147483648 : i32
    %51 = vector.broadcast %c-2147483648_i32_13 : i32 to vector<16x4xi32>
    %52 = arith.select %50, %51, %37 : vector<16x4xi1>, vector<16x4xi32>
    %53 = arith.cmpi ne, %52, %15 : vector<16x4xi32>
    %54 = vector.broadcast %28 : vector<16x1xf32> to vector<16x4xf32>
    %55 = arith.subf %2, %54 : vector<16x4xf32>
    %56 = math.exp %55 : vector<16x4xf32>
    %cst_14 = arith.constant 0.000000e+00 : f32
    %57 = vector.broadcast %cst_14 : f32 to vector<16x4xf32>
    %58 = arith.select %53, %56, %57 : vector<16x4xi1>, vector<16x4xf32>
    %cst_15 = arith.constant dense<0.000000e+00> : vector<16xf32>
    %59 = vector.multi_reduction <add>, %58, %cst_15 [1] : vector<16x4xf32> to vector<16xf32>
    %60 = vector.shape_cast %59 : vector<16xf32> to vector<16x1xf32>
    %61 = vector.broadcast %60 : vector<16x1xf32> to vector<16x4xf32>
    %62 = arith.divf %58, %61 : vector<16x4xf32>
    %c0_16 = arith.constant 0 : index
    %c0_17 = arith.constant 0 : index
    %63 = vector.load %arg2[%c0_16, %c0_17] : memref<16x6xf32, #tpu.memory_space<vmem>>, vector<16x4xf32>
    tpu.vector_store %arg2[%c0_16, %c0_17], %62 {strides = array<i32>} : memref<16x6xf32, #tpu.memory_space<vmem>>, vector<16x4xf32>,
    %64 = arith.sitofp %48 : vector<16x2xi32> to vector<16x2xf32>
    %c0_18 = arith.constant 0 : index
    %c4 = arith.constant 4 : index
    %65 = vector.load %arg2[%c0_18, %c4] : memref<16x6xf32, #tpu.memory_space<vmem>>, vector<16x2xf32>
    tpu.vector_store %arg2[%c0_18, %c4], %64 {strides = array<i32>} : memref<16x6xf32, #tpu.memory_space<vmem>>, vector<16x2xf32>,
    return
  }
}

</mosaic_0001>

<bundles_post_ra>
// kernel: tpu_custom_call.1
= control target key start
LH: loop header
LB: loop body
LE: loop exit
PB: predicated region body
PF: predicated region fallthrough
CT: control target
= control target key end

     0   :  { %vm25_vm0 = vcmask 1040384   ;;  %vm18_vm1 = vcmask 269312   ;;  %v570_v53 = vlaneseq  ;;  %vm585_vm4 = vcmask 31744   ;;  %s1051_s1 = inlined_call_operand.vmem [shape: f32[33,4], index: 1, kind: input, shape index: {}]   ;;  %s1052_s0 = inlined_call_operand.vmem [shape: f32[16,33], index: 0, kind: input, shape index: {}]   ;;  %s1053_s2 = inlined_call_operand.vmem [shape: f32[16,6], index: 2, kind: output, shape index: {}]  }
   0x1   :  { %v13_v0 = vld [vmem:[%s1051_s1] sm:$0xff]  ;;  %v14_v1 = vld [vmem:[%s1051_s1 + $0x8] sm:$0xff]  ;;  %v15_v2 = vld [vmem:[%s1051_s1 + $0x10] sm:$0xff] }
   0x2   :  { %v30_v3 = vand.u32 4294901760, %v13_v0  ;;  %v33_v4 = vand.u32 4294901760, %v14_v1  ;;  %v16_v5 = vld [vmem:[%s1051_s1 + $0x18] sm:$0xff]  ;;  %v36_v6 = vand.u32 4294901760, %v15_v2  ;;  %v17_v7 = vld [vmem:[%s1051_s1 + $0x20] sm:$0x1] }
   0x3   :  { %v39_v8 = vand.u32 4294901760, %v16_v5  ;;  %v27_v9 = vsel %vm25_vm0, %v17_v7, 0  ;;  %v11_v10 = vld [vmem:[%s1052_s0] sm:$0xff]  ;;  %v12_v11 = vld [vmem:[%s1052_s0 + $0x8] sm:$0xff]  ;;  %v992_v57 = vand.u32 127, %v570_v53  ;;  %s902_s0 = smov 4  }
   0x4   :  { %v939_v12 = vpack.c.bf16 %v33_v4, %v30_v3  ;;  %v941_v13 = vand.u32 4294901760, %v27_v9  ;;  %v20_v14 = vsel %vm18_vm1, %v11_v10, 0  ;;  %v23_v15 = vsel %vm18_vm1, %v12_v11, 0 }
   0x5   :  { %v943_v16 = vpack.c.bf16 %v39_v8, %v36_v6  ;;  %v945_v17 = vand.u32 4294901760, %v20_v14  ;;  %v947_v18 = vand.u32 4294901760, %v23_v15  ;;  %v121_v19 = vsub.f32 %v13_v0, %v30_v3 }
   0x6   :  { %836 = vmatprep.subr.bf16.mxu1 %v939_v12  ;;  %860 = vmatprep.subr.bf16.mxu0 %v939_v12  ;;  %v128_v20 = vsub.f32 %v14_v1, %v33_v4  ;;  %v135_v21 = vsub.f32 %v15_v2, %v36_v6  ;;  %v142_v22 = vsub.f32 %v16_v5, %v39_v8  ;;  %v582_v63 = vsub.s32 3, %v992_v57 }
   0x7   :  { %838 = vmatpush3.bf16.msra.mxu1 %v939_v12  ;;  %862 = vmatpush3.bf16.msra.mxu0 %v939_v12  ;;  %v954_v23 = vsub.f32 %v20_v14, %v945_v17  ;;  %v122_v24 = vand.u32 4294901760, %v121_v19  ;;  %v957_v25 = vsub.f32 %v23_v15, %v947_v18  ;;  %v960_v26 = vsub.f32 %v27_v9, %v941_v13 }
   0x8   :  { %840 = vmatprep.subr.bf16.mxu1 %v943_v16  ;;  %864 = vmatprep.subr.bf16.mxu0 %v943_v16  ;;  %v129_v27 = vand.u32 4294901760, %v128_v20  ;;  %v136_v28 = vand.u32 4294901760, %v135_v21  ;;  %v143_v29 = vand.u32 4294901760, %v142_v22  ;;  %v851_v51 = vpack.c.bf16 %v128_v20, %v121_v19 }
   0x9   :  { %v101_v30 = vand.u32 4294901760, %v954_v23  ;;  %v123_v31 = vsub.f32 %v121_v19, %v122_v24  ;;  %v111_v32 = vand.u32 4294901760, %v957_v25  ;;  %v150_v39 = vand.u32 4294901760, %v960_v26 }
   0xa   :  { %v130_v33 = vsub.f32 %v128_v20, %v129_v27  ;;  %v137_v34 = vsub.f32 %v135_v21, %v136_v28  ;;  %v144_v35 = vsub.f32 %v142_v22, %v143_v29  ;;  %v867_v44 = vpack.c.bf16 %v129_v27, %v122_v24 }
   0xb   :  { %842 = vmatpush3.bf16.msra.mxu1 %v943_v16  ;;  %866 = vmatpush3.bf16.msra.mxu0 %v943_v16  ;;  %v102_v36 = vsub.f32 %v954_v23, %v101_v30  ;;  %v124_v37 = vand.u32 4294901760, %v123_v31  ;;  %v112_v38 = vsub.f32 %v957_v25, %v111_v32  ;;  %v151_v48 = vsub.f32 %v960_v26, %v150_v39 }
   0xc   :  { %765 = vmatprep.subr.mxu1 %v941_v13  ;;  %804 = vmatprep.subr.mxu0 %v941_v13  ;;  %v131_v40 = vand.u32 4294901760, %v130_v33  ;;  %v138_v41 = vand.u32 4294901760, %v137_v34  ;;  %v145_v42 = vand.u32 4294901760, %v144_v35  ;;  %v871_v49 = vpack.c.bf16 %v143_v29, %v136_v28 }
   0xd   :  { %v103_v43 = vand.u32 4294901760, %v102_v36  ;;  %806 = vmatprep.mubr.f32.mxu0 %v101_v30  ;;  %v113_v45 = vand.u32 4294901760, %v112_v38  ;;  %v152_v50 = vand.u32 4294901760, %v151_v48  ;;  %v855_v52 = vpack.c.bf16 %v142_v22, %v135_v21 }
   0xe   :  { %v843_v46 = vpack.c.bf16 %v131_v40, %v124_v37  ;;  %v847_v47 = vpack.c.bf16 %v145_v42, %v138_v41  ;;  %vm628_vm1 = vcmp.eq.s32.totalorder %v992_v57, 0 }
   0xf   :  { %766 = vmatpush3.msra.mxu1 %v941_v13  ;;  %805 = vmatpush3.msra.mxu0 %v941_v13 }
  0x10   :  { %767 = vmatprep.mubr.f32.mxu1 %v103_v43  ;;  %844 = vmatprep.subr.bf16.mxu1 %v843_v46 }
  0x11   :  { %868 = vmatprep.subr.bf16.mxu0 %v867_v44  ;;  %768 = vmatmul.mubr.f32.vlgmr.msra.gmra.mrb[0].mxu1 %v113_v45 }
  0x12   :  { %846 = vmatpush3.bf16.msra.mxu1 %v843_v46  ;;  %807 = vmatmul.mubr.f32.vlgmr.msra.gmra.mrb[0].mxu0 %v111_v32 }
  0x13   :  { %870 = vmatpush3.bf16.msra.mxu0 %v867_v44  ;;  %848 = vmatprep.subr.bf16.mxu1 %v847_v47 }
  0x14   :  { %872 = vmatprep.subr.bf16.mxu0 %v871_v49  ;;  %780 = vmatprep.mubr.f32.mxu1 %v945_v17 }
  0x15   :  { %819 = vmatprep.mubr.f32.mxu0 %v945_v17 }
  0x16   :  { %850 = vmatpush3.bf16.msra.mxu1 %v847_v47 }
  0x17   :  { %874 = vmatpush3.bf16.msra.mxu0 %v871_v49  ;;  %778 = vmatprep.subr.mxu1 %v152_v50 }
  0x18   :  { %817 = vmatprep.subr.mxu0 %v150_v39 }
  0x1a   :  { %779 = vmatpush3.msra.mxu1 %v152_v50 }
  0x1b   :  { %818 = vmatpush3.msra.mxu0 %v150_v39  ;;  %852 = vmatprep.subr.bf16.mxu1 %v851_v51 }
  0x1c   :  { %876 = vmatprep.subr.bf16.mxu0 %v939_v12  ;;  %781 = vmatmul.mubr.f32.vlgmr.msra.gmra.mrb[0].mxu1 %v947_v18 }
  0x1d   :  { %854 = vmatpush3.bf16.msra.mxu1 %v851_v51  ;;  %820 = vmatmul.mubr.f32.vlgmr.msra.gmra.mrb[0].mxu0 %v947_v18 }
  0x1e   :  { %878 = vmatpush3.bf16.msra.mxu0 %v939_v12  ;;  %856 = vmatprep.subr.bf16.mxu1 %v855_v52 }
  0x1f   :  { %880 = vmatprep.subr.bf16.mxu0 %v943_v16  ;;  %793 = vmatprep.mubr.f32.mxu1 %v954_v23 }
  0x20   :  { %832 = vmatprep.mubr.f32.mxu0 %v945_v17 }
  0x21   :  { %858 = vmatpush3.bf16.msra.mxu1 %v855_v52 }
  0x22   :  { %882 = vmatpush3.bf16.msra.mxu0 %v943_v16  ;;  %791 = vmatprep.subr.mxu1 %v960_v26 }
  0x23   :  { %830 = vmatprep.subr.mxu0 %v941_v13 }
  0x25   :  { %792 = vmatpush3.msra.mxu1 %v960_v26 }
  0x26   :  { %831 = vmatpush3.msra.mxu0 %v941_v13  ;;  %794 = vmatmul.mubr.f32.vlgmr.msra.gmra.mrb[0].mxu1 %v957_v25 }
  0x27   :  { %833 = vmatmul.mubr.f32.vlgmr.msra.gmra.mrb[0].mxu0 %v947_v18 }
  0xf9   :  { %v795_v54 = vpop.f32.mrb[0].mxu1 }
  0xfa   :  { %v834_v55 = vpop.f32.mrb[0].mxu0  ;;  %v299_v56 = vpop.f32.mrb[1].mxu1 }
  0xfb   :  { %v994_v58 = vadd.f32 %v834_v55, %v795_v54  ;;  %v560_v59 = vpop.f32.mrb[1].mxu0 }
  0xfc   :  { %v996_v60 = vadd.f32 %v560_v59, %v299_v56 }
  0xfd   :  { %vm575_vm2 = vcmp.lt.s32.totalorder %v994_v58, 0  ;;  %v577_v61 = vxor.u32 2147483647, %v994_v58 }
  0xfe   :  { %vm574_vm3 = vcmp.lt.s32.totalorder %v996_v60, 0  ;;  %v576_v62 = vxor.u32 2147483647, %v996_v60 }
  0xff   :  { %v579_v0 = vsel %vm575_vm2, %v577_v61, %v994_v58  ;;  %vm669_vm2 = vcmp.eq.s32.totalorder %v992_v57, 1 }
 0x100   :  { %v581_v1 = vand.u32 4294967292, %v579_v0  ;;  %v578_v2 = vsel %vm574_vm3, %v576_v62, %v996_v60  ;;  %vm708_vm3 = vcmask 48160  }
 0x101   :  { %v580_v3 = vand.u32 4294967292, %v578_v2 }
 0x102   :  { %v1005_v4 = vor.u32 %v582_v63, %v581_v1 }
 0x103   :  { %v1007_v5 = vor.u32 %v582_v63, %v580_v3 }
 0x104   :  { %v601_v7 = vsel %vm585_vm4, %v1005_v4, 2147483648 }
 0x105   :  { %v586_v6 = vsel %vm585_vm4, %v1007_v5, 2147483648  ;;  %v603_v10 = vshra.s32 %v601_v7, 16  ;;  %v602_v15 = vand.u32 65535, %v601_v7 }
 0x106   :  { %v588_v8 = vshra.s32 %v586_v6, 16  ;;  %v587_v12 = vand.u32 65535, %v586_v6 }
 0x107   :  { %v605_v11 = vcvt.s32.f32 %v603_v10  ;;  %v604_v18 = vcvt.s32.f32 %v602_v15 }
 0x108   :  { %v590_v9 = vcvt.s32.f32 %v588_v8  ;;  %v589_v14 = vcvt.s32.f32 %v587_v12 }
 0x10a   :  { %591 = vmax.xlane.f32.xlu0 %v590_v9 }
 0x10e   :  { %606 = vmax.xlane.f32.xlu0 %v605_v11 }
 0x197   :  { %v592_v13 = vpop.xlane.xlu0 %591 }
 0x198   :  { %vm593_vm5 = vcmp.eq.f32.partialorder %v590_v9, %v592_v13  ;;  %v598_v20 = vcvt.f32.s32 %v592_v13 }
 0x199   :  { %v594_v16 = vsel %vm593_vm5, %v589_v14, -inf }
 0x19a   :  { %595 = vmax.xlane.f32.xlu1 %v594_v16  ;;  %v599_v22 = vshll.u32 %v598_v20, 16 }
 0x19b   :  { %v607_v17 = vpop.xlane.xlu0 %606 }
 0x19c   :  { %vm608_vm6 = vcmp.eq.f32.partialorder %v605_v11, %v607_v17  ;;  %v613_v23 = vcvt.f32.s32 %v607_v17 }
 0x19d   :  { %v609_v19 = vsel %vm608_vm6, %v604_v18, -inf }
 0x19e   :  { %610 = vmax.xlane.f32.xlu1 %v609_v19  ;;  %v614_v27 = vshll.u32 %v613_v23, 16 }
 0x227   :  { %v596_v21 = vpop.xlane.xlu1 %595 }
 0x228   :  { %v597_v24 = vcvt.f32.s32 %v596_v21 }
 0x22a   :  { %v600_v25 = vadd.s32 %v599_v22, %v597_v24 }
 0x22b   :  { %v611_v26 = vpop.xlane.xlu1 %610 }
 0x22c   :  { %v612_v28 = vcvt.f32.s32 %v611_v26  ;;  %v616_v29 = vand.u32 3, %v600_v25  ;;  %v622_v50 = vxor.u32 2147483647, %v600_v25  ;;  %vm620_vm11 = vcmp.lt.s32.totalorder %v600_v25, 0 }
 0x22e   :  { %v615_v30 = vadd.s32 %v614_v27, %v612_v28  ;;  %v1013_v31 = vsub.s32 3, %v616_v29  ;;  %v624_v51 = vsel %vm620_vm11, %v622_v50, %v600_v25 }
 0x22f   :  { %v678_v53 = vsub.f32 %v996_v60, %v624_v51 }
 0x230   :  { %vm631_vm7 = vcmp.eq.s32.totalorder %v992_v57, %v1013_v31  ;;  %v617_v32 = vand.u32 3, %v615_v30  ;;  %v623_v52 = vxor.u32 2147483647, %v615_v30  ;;  %vm621_vm12 = vcmp.lt.s32.totalorder %v615_v30, 0 }
 0x231   :  { %v633_v33 = vsel %vm631_vm7, 2147483648, %v1007_v5  ;;  %v680_v55 = vmul.f32 1.442695, %v678_v53  ;;  %v629_v20 = vsel %vm628_vm1, %v1013_v31, 0 }
 0x232   :  { %v635_v34 = vsel %vm585_vm4, %v633_v33, 2147483648  ;;  %v1019_v35 = vsub.s32 3, %v617_v32  ;;  %v625_v54 = vsel %vm621_vm12, %v623_v52, %v615_v30 }
 0x233   :  { %v637_v36 = vshra.s32 %v635_v34, 16  ;;  %v636_v42 = vand.u32 65535, %v635_v34  ;;  %v679_v56 = vsub.f32 %v994_v58, %v625_v54  ;;  %894 = vpow2.f32 %v680_v55 }
 0x234   :  { %vm632_vm8 = vcmp.eq.s32.totalorder %v992_v57, %v1019_v35 }
 0x235   :  { %v639_v37 = vcvt.s32.f32 %v637_v36  ;;  %v634_v38 = vsel %vm632_vm8, 2147483648, %v1005_v4  ;;  %v638_v44 = vcvt.s32.f32 %v636_v42  ;;  %v682_v62 = vmul.f32 1.442695, %v679_v56 }
 0x236   :  { %v650_v39 = vsel %vm585_vm4, %v634_v38, 2147483648 }
 0x237   :  { %640 = vmax.xlane.f32.xlu0 %v639_v37  ;;  %v652_v40 = vshra.s32 %v650_v39, 16  ;;  %v651_v45 = vand.u32 65535, %v650_v39  ;;  %896 = vpow2.f32 %v682_v62 }
 0x239   :  { %v654_v41 = vcvt.s32.f32 %v652_v40  ;;  %v653_v48 = vcvt.s32.f32 %v651_v45 }
 0x23b   :  { %655 = vmax.xlane.f32.xlu1 %v654_v41 }
 0x23d   :  { %v895_v11 = vpop.eup %894 }
 0x241   :  { %v897_v16 = vpop.eup %896 }
 0x2c4   :  { %v641_v43 = vpop.xlane.xlu0 %640 }
 0x2c5   :  { %vm642_vm9 = vcmp.eq.f32.partialorder %v639_v37, %v641_v43  ;;  %v647_v59 = vcvt.f32.s32 %v641_v43 }
 0x2c6   :  { %v643_v46 = vsel %vm642_vm9, %v638_v44, -inf }
 0x2c7   :  { %644 = vmax.xlane.f32.xlu0 %v643_v46  ;;  %v648_v63 = vshll.u32 %v647_v59, 16 }
 0x2c8   :  { %v656_v47 = vpop.xlane.xlu1 %655 }
 0x2c9   :  { %vm657_vm10 = vcmp.eq.f32.partialorder %v654_v41, %v656_v47  ;;  %v662_v0 = vcvt.f32.s32 %v656_v47 }
 0x2ca   :  { %v658_v49 = vsel %vm657_vm10, %v653_v48, -inf }
 0x2cb   :  { %659 = vmax.xlane.f32.xlu1 %v658_v49  ;;  %v663_v6 = vshll.u32 %v662_v0, 16 }
 0x354   :  { %v645_v61 = vpop.xlane.xlu0 %644 }
 0x355   :  { %v646_v1 = vcvt.f32.s32 %v645_v61 }
 0x357   :  { %v649_v2 = vadd.s32 %v648_v63, %v646_v1 }
 0x358   :  { %v660_v3 = vpop.xlane.xlu1 %659 }
 0x359   :  { %v665_v7 = vand.u32 3, %v649_v2  ;;  %v661_v8 = vcvt.f32.s32 %v660_v3 }
 0x35b   :  { %v667_v9 = vsub.s32 3, %v665_v7  ;;  %v664_v10 = vadd.s32 %v663_v6, %v661_v8 }
 0x35d   :  { %v666_v60 = vand.u32 3, %v664_v10  ;;  %vm672_vm13 = vcmp.eq.s32.totalorder %v992_v57, %v667_v9  ;;  %v670_v21 = vsel %vm669_vm2, %v667_v9, %v629_v20 }
 0x35e   :  { %v674_v58 = vsel %vm672_vm13, 2147483648, %v633_v33  ;;  %v698_v23 = vcvt.s32.f32 %v670_v21 }
 0x35f   :  { %v668_v12 = vsub.s32 3, %v666_v60  ;;  %vm676_vm14 = vcmp.ne.s32.totalorder %v674_v58, %v1007_v5  ;;  %v630_v5 = vsel %vm628_vm1, %v1019_v35, 0 }
 0x360   :  { %v684_v13 = vsel %vm676_vm14, %v895_v11, 0.0 }
 0x361   :  { %v686_v14 = vsel %vm585_vm4, %v684_v13, 0.0  ;;  %vm673_vm15 = vcmp.eq.s32.totalorder %v992_v57, %v668_v12  ;;  %v671_v19 = vsel %vm669_vm2, %v668_v12, %v630_v5 }
 0x362   :  { %687 = vadd.xlane.f32.xlu0 %v686_v14  ;;  %v675_v15 = vsel %vm673_vm15, 2147483648, %v634_v38  ;;  %v699_v22 = vcvt.s32.f32 %v671_v19 }
 0x363   :  { %vm677_vm0 = vcmp.ne.s32.totalorder %v675_v15, %v1005_v4 }
 0x364   :  { %v685_v17 = vsel %vm677_vm0, %v897_v16, 0.0 }
 0x365   :  { %v689_v18 = vsel %vm585_vm4, %v685_v17, 0.0 }
 0x366   :  { %690 = vadd.xlane.f32.xlu1 %v689_v18 }
 0x377   :  { %704 = vrot.lane.b32.xlu1 %v699_v22, %s902_s0 }
 0x378   :  { %702 = vrot.lane.b32.xlu0 %v698_v23, %s902_s0 }
 0x3ef   :  { %v688_v4 = vpop.xlane.xlu0 %687 }
 0x3f0   :  { %898 = vrcp.f32 %v688_v4 }
 0x3f3   :  { %v691_v24 = vpop.xlane.xlu1 %690  ;;  %v703_v57 = vpop.permute.xlu0 %702 }
 0x3f4   :  { %900 = vrcp.f32 %v691_v24 }
 0x3f7   :  { %v705_v29 = vpop.permute.xlu1 %704 }
 0x3fa   :  { %v899_v25 = vpop.eup %898 }
 0x3fb   :  { %v693_v26 = vmul.f32 %v899_v25, %v684_v13 }
 0x3fd   :  { %696 = vst.msk [vmem:[%s1053_s2] sm:$0xff] %vm585_vm4, %v693_v26 }
 0x3fe   :  { %v901_v27 = vpop.eup %900  ;;  %709 = vst.msk [vmem:[%s1053_s2] sm:$0xff] %vm708_vm3, %v703_v57 }
 0x3ff   :  { %v695_v28 = vmul.f32 %v901_v27, %v685_v17 }
 0x401   :  { %697 = vst.msk [vmem:[%s1053_s2 + $0x8] sm:$0xff] %vm585_vm4, %v695_v28 }
 0x402   :  { %710 = vst.msk [vmem:[%s1053_s2 + $0x8] sm:$0xff] %vm708_vm3, %v705_v29 }

</bundles_post_ra>
